<compile_context>
chip_gen: v5e
topology: v5e:2x2
jax: 0.10.0
libtpu: 0.0.40
codegen_flags: <defaults>
</compile_context>

<pallas_src>
import functools

import jax
import jax.numpy as jnp
from jax.experimental import pallas as pl
from jax.experimental.pallas import tpu as pltpu


def _layernorm_kernel(x_ref, w_ref, b_ref, o_ref, *, with_bias: bool):
    # x_ref: (1, C, TL) tile; w_ref / b_ref: (C, 1) (C already on sublanes,
    # so broadcasting against the tile needs no relayout).
    x = x_ref[...].astype(jnp.float32)                     # (1, C, TL)
    w = w_ref[...].astype(jnp.float32)[None]               # (1, C, 1)

    inv_c = jnp.float32(1.0 / x.shape[1])
    mu = jnp.sum(x, axis=1, keepdims=True) * inv_c         # (1, 1, TL)
    ex2 = jnp.sum(x * x, axis=1, keepdims=True) * inv_c    # single pass
    var = ex2 - mu * mu                                    # unbiased=False
    rstd = jax.lax.rsqrt(var + 1e-5)

    if with_bias:
        b = b_ref[...].astype(jnp.float32)[None]           # (1, C, 1)
        y = (x - mu) * rstd * w + b
    else:
        # NOTE: BiasFree_LayerNorm intentionally normalizes x (NOT x - mu)
        # while still using the mean-subtracted variance.  Do not "fix".
        y = x * rstd * w
    o_ref[...] = y.astype(o_ref.dtype)


def _pick_tl(L: int, C: int, itemsize: int, budget_bytes: int = 2 << 20) -> int:
    """Spatial tile length: ~2 MiB per input tile, a multiple of 128 (or full L)."""
    tl = max(128, (budget_bytes // max(1, C * itemsize)) // 128 * 128)
    return L if L <= tl else tl


def _layernorm_bcl(x_bcl, weight, bias, with_bias: bool):
    B, C, L = x_bcl.shape
    w2 = weight.reshape(C, 1)
    b2 = bias.reshape(C, 1)
    tl = _pick_tl(L, C, x_bcl.dtype.itemsize)
    kernel = functools.partial(_layernorm_kernel, with_bias=with_bias)
    return pl.pallas_call(
        kernel,
        out_shape=jax.ShapeDtypeStruct((B, C, L), x_bcl.dtype),
        grid_spec=pltpu.PrefetchScalarGridSpec(
            num_scalar_prefetch=0,
            grid=(B, pl.cdiv(L, tl)),
            in_specs=[
                pl.BlockSpec((1, C, tl), lambda b, l: (b, 0, l)),
                pl.BlockSpec((C, 1), lambda b, l: (0, 0)),
                pl.BlockSpec((C, 1), lambda b, l: (0, 0)),
            ],
            out_specs=pl.BlockSpec((1, C, tl), lambda b, l: (b, 0, l)),
        ),
        compiler_params=pltpu.CompilerParams(
            dimension_semantics=("parallel", "parallel"),
            vmem_limit_bytes=32 << 20,
        ),
    )(x_bcl, w2, b2)


class LayerNormPallas:
    """Mirrors LayerNorm(dim, LayerNorm_type) forward on NCHW inputs."""

    def __init__(self, dim, layernorm_type="WithBias"):
        self.dim = dim
        self.with_bias = (layernorm_type != "BiasFree")
        # deterministic init, matching nn.Parameter(torch.ones/zeros)
        self.weight = jnp.ones((dim,), jnp.float32)
        self.bias = jnp.zeros((dim,), jnp.float32)

    def __call__(self, x):
        # x: (B, C, H, W).  No NCHW<->NHWC transposes -- just a free reshape;
        # the kernel reduces over C directly in the native layout.
        B, C, H, W = x.shape
        y = _layernorm_bcl(x.reshape(B, C, H * W), self.weight, self.bias,
                           self.with_bias)
        return y.reshape(B, C, H, W)


def _reference(x, weight, bias, with_bias):
    B, C, H, W = x.shape
    x3 = jnp.transpose(x, (0, 2, 3, 1)).reshape(B, H * W, C)
    mu = jnp.mean(x3, axis=-1, keepdims=True)
    var = jnp.mean((x3 - mu) ** 2, axis=-1, keepdims=True)
    if with_bias:
        y3 = (x3 - mu) / jnp.sqrt(var + 1e-5) * weight + bias
    else:
        y3 = x3 / jnp.sqrt(var + 1e-5) * weight
    return jnp.transpose(y3.reshape(B, H, W, C), (0, 3, 1, 2))


if __name__ == "__main__":
    key = jax.random.PRNGKey(0)
    B, C, H, W = 2, 4, 16, 16
    x = jax.random.normal(key, (B, C, H, W), jnp.float32)

    # WithBias variant (default branch of LayerNorm)
    ln_wb = LayerNormPallas(C, "WithBias")
    y_wb = jax.block_until_ready(ln_wb(x))
    ref_wb = _reference(x, ln_wb.weight, ln_wb.bias, True)

    # BiasFree variant
    ln_bf = LayerNormPallas(C, "BiasFree")
    y_bf = jax.block_until_ready(ln_bf(x))
    ref_bf = _reference(x, ln_bf.weight, ln_bf.bias, False)

    assert y_wb.shape == (B, C, H, W)
    assert jnp.max(jnp.abs(y_wb - ref_wb)) < 1e-4
    assert jnp.max(jnp.abs(y_bf - ref_bf)) < 1e-4
    print("KERNEL_OK")
</pallas_src>

<mosaic_0001>
module attributes {stable_mosaic.version = 11 : i64} {
  func.func @_layernorm_kernel(%arg0: i32, %arg1: i32, %arg2: memref<1x4x256xf32, #tpu.memory_space<vmem>>, %arg3: memref<4x1xf32, #tpu.memory_space<vmem>>, %arg4: memref<4x1xf32, #tpu.memory_space<vmem>>, %arg5: memref<1x4x256xf32, #tpu.memory_space<vmem>>) attributes {dimension_semantics = [#tpu.dimension_semantics<parallel>, #tpu.dimension_semantics<parallel>], iteration_bounds = array<i64: 2, 1>, scalar_prefetch = 0 : i64, scratch_operands = 0 : i64, tpu.core_type = #tpu.core_type<tc>, window_params = [{transform_indices = @transform_0, window_bounds = array<i64: 1, 4, 256>}, {pipeline_mode = #tpu.pipeline_mode<synchronous>, transform_indices = @transform_1, window_bounds = array<i64: 4, 1>}, {pipeline_mode = #tpu.pipeline_mode<synchronous>, transform_indices = @transform_2, window_bounds = array<i64: 4, 1>}, {transform_indices = @transform_3, window_bounds = array<i64: 1, 4, 256>}]} {
    %c0 = arith.constant 0 : index
    %c0_0 = arith.constant 0 : index
    %c0_1 = arith.constant 0 : index
    %0 = vector.load %arg2[%c0, %c0_0, %c0_1] : memref<1x4x256xf32, #tpu.memory_space<vmem>>, vector<1x4x256xf32>
    %c0_2 = arith.constant 0 : index
    %c0_3 = arith.constant 0 : index
    %1 = vector.load %arg3[%c0_2, %c0_3] : memref<4x1xf32, #tpu.memory_space<vmem>>, vector<4x1xf32>
    %2 = vector.shape_cast %1 : vector<4x1xf32> to vector<1x4x1xf32>
    %cst = arith.constant dense<0.000000e+00> : vector<1x256xf32>
    %3 = vector.multi_reduction <add>, %0, %cst [1] : vector<1x4x256xf32> to vector<1x256xf32>
    %4 = vector.shape_cast %3 : vector<1x256xf32> to vector<1x1x256xf32>
    %cst_4 = arith.constant 2.500000e-01 : f32
    %5 = vector.broadcast %cst_4 : f32 to vector<1x1x256xf32>
    %6 = arith.mulf %4, %5 : vector<1x1x256xf32>
    %7 = arith.mulf %0, %0 : vector<1x4x256xf32>
    %cst_5 = arith.constant dense<0.000000e+00> : vector<1x256xf32>
    %8 = vector.multi_reduction <add>, %7, %cst_5 [1] : vector<1x4x256xf32> to vector<1x256xf32>
    %9 = vector.shape_cast %8 : vector<1x256xf32> to vector<1x1x256xf32>
    %cst_6 = arith.constant 2.500000e-01 : f32
    %10 = vector.broadcast %cst_6 : f32 to vector<1x1x256xf32>
    %11 = arith.mulf %9, %10 : vector<1x1x256xf32>
    %12 = arith.mulf %6, %6 : vector<1x1x256xf32>
    %13 = arith.subf %11, %12 : vector<1x1x256xf32>
    %cst_7 = arith.constant 9.99999974E-6 : f32
    %14 = vector.broadcast %cst_7 : f32 to vector<1x1x256xf32>
    %15 = arith.addf %13, %14 : vector<1x1x256xf32>
    %16 = math.rsqrt %15 : vector<1x1x256xf32>
    %c0_8 = arith.constant 0 : index
    %c0_9 = arith.constant 0 : index
    %17 = vector.load %arg4[%c0_8, %c0_9] : memref<4x1xf32, #tpu.memory_space<vmem>>, vector<4x1xf32>
    %18 = vector.shape_cast %17 : vector<4x1xf32> to vector<1x4x1xf32>
    %19 = vector.broadcast %6 : vector<1x1x256xf32> to vector<1x4x256xf32>
    %20 = arith.subf %0, %19 : vector<1x4x256xf32>
    %21 = vector.broadcast %16 : vector<1x1x256xf32> to vector<1x4x256xf32>
    %22 = arith.mulf %20, %21 : vector<1x4x256xf32>
    %23 = vector.broadcast %2 : vector<1x4x1xf32> to vector<1x4x256xf32>
    %24 = arith.mulf %22, %23 : vector<1x4x256xf32>
    %25 = vector.broadcast %18 : vector<1x4x1xf32> to vector<1x4x256xf32>
    %26 = arith.addf %24, %25 : vector<1x4x256xf32>
    %c0_10 = arith.constant 0 : index
    %c0_11 = arith.constant 0 : index
    %c0_12 = arith.constant 0 : index
    %27 = vector.load %arg5[%c0_10, %c0_11, %c0_12] : memref<1x4x256xf32, #tpu.memory_space<vmem>>, vector<1x4x256xf32>
    tpu.vector_store %arg5[%c0_10, %c0_11, %c0_12], %26 {strides = array<i32>} : memref<1x4x256xf32, #tpu.memory_space<vmem>>, vector<1x4x256xf32>,
    return
  }
  func.func @transform_0(%arg0: i32, %arg1: i32) -> (i32, i32, i32) {
    %c0_i32 = arith.constant 0 : i32
    %c0_i32_0 = arith.constant 0 : i32
    return %arg0, %c0_i32, %arg1 : i32, i32, i32
  }
  func.func @transform_1(%arg0: i32, %arg1: i32) -> (i32, i32) {
    %c0_i32 = arith.constant 0 : i32
    %c0_i32_0 = arith.constant 0 : i32
    %c0_i32_1 = arith.constant 0 : i32
    return %c0_i32, %c0_i32_0 : i32, i32
  }
  func.func @transform_2(%arg0: i32, %arg1: i32) -> (i32, i32) {
    %c0_i32 = arith.constant 0 : i32
    %c0_i32_0 = arith.constant 0 : i32
    %c0_i32_1 = arith.constant 0 : i32
    return %c0_i32, %c0_i32_0 : i32, i32
  }
  func.func @transform_3(%arg0: i32, %arg1: i32) -> (i32, i32, i32) {
    %c0_i32 = arith.constant 0 : i32
    %c0_i32_0 = arith.constant 0 : i32
    return %arg0, %c0_i32, %arg1 : i32, i32, i32
  }
}

</mosaic_0001>

<bundles_post_ra>
// kernel: tpu_custom_call.1
= control target key start
LH: loop header
LB: loop body
LE: loop exit
PB: predicated region body
PF: predicated region fallthrough
CT: control target
= control target key end

     0   :  { %8 = vsyncpa [#allocation3], 0  ;;  %s784_s0 = inlined_call_operand.hbm [shape: f32[2,4,256], index: 0, kind: input, shape index: {}]   ;;  %s785_s1 = inlined_call_operand.vmem [shape: f32[4,1], index: 1, kind: input, shape index: {}]   ;;  %s786_s2 = inlined_call_operand.vmem [shape: f32[4,1], index: 2, kind: input, shape index: {}]   ;;  %s787_s3 = inlined_call_operand.hbm [shape: f32[2,4,256], index: 3, kind: output, shape index: {}]  }
   0x1   :  { %10 = vsyncpa [#allocation3 + $0x1], 0 }
   0x2   :  { %11 = vsyncpa [#allocation4], 0 }
   0x3   :  { %13 = vsyncpa [#allocation4 + $0x1], 0  ;;  %s642_s12 = smov 0   ;;  %s644_s13 = smov 0  }
   0x4   :  { %s646_s14 = smov 0   ;;  %s648_s15 = smov 0  }
   0x5   :  { %s650_s16 = smov 0   ;;  %s652_s17 = smov 0  }
   0x6 LB: > { %s420_s18 = sadd.s32 4294967295, %s618_s17   ;;  %s421_s19 = sadd.s32 4294967294, %s618_s17   ;;  %s618_s17 = sphi %s652_s17, %s19_s17   ;;  %s614_s16 = sphi %s650_s16, %s796_s16   ;;  %s610_s15 = sphi %s648_s15, %s795_s15   ;;  %s606_s14 = sphi %s646_s14, %s794_s14   ;;  %s602_s13 = sphi %s644_s13, %s793_s13   ;;  %s598_s12 = sphi %s642_s12, %s792_s12  }
   0x7   : > { %s31_s20 = sadd.s32 1, %s614_s16  ;;  %s40_s21 = sadd.s32 1, %s606_s14 }
   0x8   : > { %p33_p0 = scmp.ge.s32.totalorder %s31_s20, 2  ;;  %p47_p1 = scmp.ne.s32.totalorder %s606_s14, %s602_s13 }
   0x9   : > { %p48_p2 = scmp.eq.s32.totalorder %s618_s17, 0  ;;  %p53_p3 = scmp.ne.s32.totalorder %s602_s13, %s598_s12 }
   0xa   : > { %s798_s20 = smov (%p33_p0, %s31_s20), 0  ;;  %p54_p5 = scmp.eq.s32.totalorder %s420_s18, 0 }
   0xb   : > { %p683_p4 = por %p48_p2, %p47_p1  ;;  %s35_s23 = ssub.s32 %s614_s16, %s798_s20 }
   0xc   : > { %p121_p6 = scmp.eq.s32.totalorder %s420_s18, 1  ;;  %p38_p7 = scmp.eq.s32.totalorder %s35_s23, 0 }
   0xd   : > { %p689_p8 = por %p54_p5, %p53_p3  ;;  %p127_p10 = scmp.eq.s32.totalorder %s421_s19, 1 }
   0xe   : > { %p693_p9 = por %p121_p6, %p47_p1  ;;  %p423_p12 = scmp.ge.s32.totalorder %s618_s17, 2 }
   0xf   : > { %s698_s26 = scalar_select %p38_p7, %s606_s14, %s40_s21  }
  0x10   : > { %p700_p11 = por %p127_p10, %p53_p3  ;;  %p449_p13 = scmp.lt.s32.totalorder %s618_s17, 2 }
  0x11   : > { %s153_s28 = sand.u32 1, %s606_s14   ;;  %s435_s30 = sshll.u32 %s614_s16, 3 }
  0x12   : > { %s424_s29 = sshll.u32 %s153_s28, 3  ;;  %s164_s6 = scalar_lea.hbm %s784_s0, %s435_s30 }
  0x13   : > { %s157_s7 = scalar_lea.vmem [#allocation2], %s424_s29  ;;  %s166_s9 = sshll.u32 %s164_s6, 4  ;;  %s167_s9 = int_to_ptr.hbm [resolvable:$true] %s166_s9 }
  0x14   : > { %s168_s8 = sshll.u32 %s157_s7, 4  ;;  %p442_p0 = pnand %p449_p13, %p683_p4  ;;  %s169_s8 = int_to_ptr.vmem [resolvable:$true] %s168_s8 }
  0x15   : > { %p427_p1 = scmp.ge.s32.totalorder %s618_s17, 1  ;;  %p173_p2 = scmp.lt.s32.totalorder %s618_s17, 3 }
  0x16   : > { %s154_s10 = scalar_lea.sflag [#allocation3], %s153_s28 }
  0x17   : > { %444 = dma.hbm_to_vmem [thread:$0]  (!%p442_p0), %s167_s9, 128, %s169_s8, %s154_s10  }
  0x18   : > { %p174_p3 = pnand %p427_p1, %p173_p2 }
  0x19   : > { %s716_s11 = sand.u32 (!%p174_p3), 1, %s602_s13  }
  0x1a   : > { %177 = sbr.rel (%p174_p3) target bundleno = 164 (0xa4), region = 32  ;;  %s428_s18 = sshll.u32 (!%p174_p3), %s716_s11, 3 }
  0x1b   : > { %s180_s19 = scalar_lea.sflag (!%p174_p3), [#allocation3], %s716_s11  ;;  %s183_s21 = scalar_lea.vmem (!%p174_p3), [#allocation2], %s428_s18 }
  0x1f   : > { %589 = dma.done.wait (%p689_p8), %s180_s19, 128  }
  0x20   : > { %591 = vsyncadd (%p689_p8), %s180_s19, 4294967168  ;;  %v620_v0 = vmov 0   ;;  %v210_v1 = vld [vmem:[%s785_s1] sm:$0xf]  ;;  %v732_v3 = vld [vmem:[%s183_s21] sm:$0xff]  ;;  %vm217_vm0 = vcmask 1043456  }
  0x21   : > { %501 = vset.pattern.permute.xlu0 %v620_v0  ;;  %v283_v2 = vld [vmem:[%s786_s2] sm:$0xf]  ;;  %212 = vst [vmem:[#allocation1] ss:$2 sm:$0xff] %v732_v3  ;;  %v234_v4 = vmul.f32 %v732_v3, %v732_v3  ;;  %v621_v61 = vmov 839922192  }
  0x22   : > { %298 = vperm.xlu0 %501, %v210_v1   ;;  %v301_v62 = vunpack.c.l.s4 %v621_v61  ;;  %s436_s24 = sshll.u32 %s610_s15, 3  ;;  %s206_s6 = scalar_lea.vmem [#allocation5], %s428_s18 }
  0x23   : > { %s331_s5 = scalar_lea.hbm %s787_s3, %s436_s24  ;;  %s333_s7 = sshll.u32 %s206_s6, 4  ;;  %s334_s7 = int_to_ptr.vmem [resolvable:$true] %s333_s7 }
  0x24   : > { %s335_s8 = sshll.u32 %s331_s5, 4  ;;  %s318_s9 = scalar_lea.sflag [#allocation4], %s716_s11  ;;  %s336_s8 = int_to_ptr.hbm [resolvable:$true] %s335_s8 }
  0x25   : > { %s550_s15 = sshra.s32 %s336_s8, 4  ;;  %s556_s18 = scalar_lea.hbm %s787_s3, 16  ;;  %s551_s15 = int_to_ptr.hbm [resolvable:$true] %s550_s15 }
  0x26   : > { %s552_s10 = scalar_lea.hbm %s551_s15, 8  ;;  %p557_p7 = scmp.lt.s32.totalorder %s551_s15, %s787_s3 }
  0x27   : > { %p553_p4 = scmp.ne.s32.totalorder %s551_s15, %s552_s10  ;;  %p558_p8 = scmp.lt.s32.totalorder %s556_s18, %s552_s10 }
  0x28   : > { %v213_v5 = vld.sshfl [vmem:[#allocation1] sm:$0xff pattern:$0x75316420]  ;;  %v214_v6 = vld.sshfl [vmem:[#allocation1 + $0x8] sm:$0xff pattern:$0x75316420] }
  0x29   : > { %236 = vst [vmem:[#allocation1] ss:$2 sm:$0xff] %v234_v4  ;;  %v225_v7 = vsel %vm217_vm0, %v214_v6, 0.0  ;;  %v218_v10 = vsel %vm217_vm0, %v213_v5, 0.0  ;;  %v302_v4 = vunpack.c.0.s8 %v301_v62  ;;  %p554_p5 = pnand %p553_p4, %p693_p9  ;;  %p559_p10 = por %p558_p8, %p557_p7 }
  0x2a   : > { %308 = vperm.xlu0 %501, %v283_v2   ;;  %v226_v8 = vrot.slane %v225_v7, 4  ;;  %v219_v12 = vrot.slane %v218_v10, 4 }
  0x2b   : > { %p555_p6 = pneg %p554_p5 }
  0x2c   : > { %v227_v13 = vadd.f32 %v226_v8, %v225_v7  ;;  %v220_v17 = vadd.f32 %v219_v12, %v218_v10 }
  0x2d   : > { %p560_p13 = pnand %p559_p10, %p555_p6 }
  0x2e   : > { %v228_v18 = vrot.slane %v227_v13, 2  ;;  %v221_v21 = vrot.slane %v220_v17, 2 }
  0x30   : > { %v238_v9 = vld.sshfl [vmem:[#allocation1 + $0x8] sm:$0xff pattern:$0x75316420]  ;;  %v237_v14 = vld.sshfl [vmem:[#allocation1] sm:$0xff pattern:$0x75316420]  ;;  %v229_v22 = vadd.f32 %v228_v18, %v227_v13  ;;  %v222_v25 = vadd.f32 %v221_v21, %v220_v17 }
  0x31   : > { %v248_v11 = vsel %vm217_vm0, %v238_v9, 0.0  ;;  %v241_v16 = vsel %vm217_vm0, %v237_v14, 0.0 }
  0x32   : > { %v249_v15 = vrot.slane %v248_v11, 4  ;;  %v242_v19 = vrot.slane %v241_v16, 4  ;;  %v230_v26 = vrot.slane %v229_v22, 1  ;;  %v223_v29 = vrot.slane %v222_v25, 1 }
  0x34   : > { %v250_v20 = vadd.f32 %v249_v15, %v248_v11  ;;  %v243_v23 = vadd.f32 %v242_v19, %v241_v16  ;;  %v231_v30 = vadd.f32 %v230_v26, %v229_v22  ;;  %v224_v33 = vadd.f32 %v223_v29, %v222_v25 }
  0x36   : > { %v251_v24 = vrot.slane %v250_v20, 2  ;;  %v244_v27 = vrot.slane %v243_v23, 2  ;;  %v233_v34 = vmul.f32 0.25, %v231_v30  ;;  %v232_v37 = vmul.f32 0.25, %v224_v33 }
  0x38   : > { %v252_v28 = vadd.f32 %v251_v24, %v250_v20  ;;  %v245_v31 = vadd.f32 %v244_v27, %v243_v23  ;;  %v258_v40 = vmul.f32 %v233_v34, %v233_v34  ;;  %v257_v42 = vmul.f32 %v232_v37, %v232_v37 }
  0x39   : > { %v286_v58 = vrot.slane %v233_v34, 4 }
  0x3a   : > { %v253_v32 = vrot.slane %v252_v28, 1  ;;  %v246_v35 = vrot.slane %v245_v31, 1 }
  0x3b   : > { %v287_v63 = vsel %vm217_vm0, %v232_v37, %v286_v58 }
  0x3c   : > { %v254_v36 = vadd.f32 %v253_v32, %v252_v28  ;;  %v247_v38 = vadd.f32 %v246_v35, %v245_v31  ;;  %v289_v5 = vsub.f32 %v732_v3, %v287_v63 }
  0x3e   : > { %v256_v39 = vmul.f32 0.25, %v254_v36  ;;  %v255_v41 = vmul.f32 0.25, %v247_v38 }
  0x40   : > { %v260_v43 = vsub.f32 %v256_v39, %v258_v40  ;;  %v259_v44 = vsub.f32 %v255_v41, %v257_v42 }
  0x42   : > { %v262_v45 = vadd.f32 1e-05, %v260_v43  ;;  %v261_v46 = vadd.f32 1e-05, %v259_v44 }
  0x44   : > { %502 = vrsqrt.f32 %v262_v45  ;;  %vm279_vm1 = vweird.f32 %v262_v45  ;;  %vm269_vm4 = vweird.f32 %v261_v46 }
  0x45   : > { %504 = vrsqrt.f32 %v261_v46 }
  0x4a   : > { %v503_v47 = vpop.eup %502 }
  0x4b   : > { %v274_v48 = vmul.f32 %v503_v47, %v262_v45  ;;  %v505_v49 = vpop.eup %504  ;;  %vm280_vm2 = vweird.f32 %v503_v47 }
  0x4c   : > { %v264_v50 = vmul.f32 %v505_v49, %v261_v46  ;;  %vm281_vm3 = vmor %vm279_vm1, %vm280_vm2  ;;  %vm270_vm5 = vweird.f32 %v505_v49 }
  0x4d   : > { %v275_v51 = vmul.f32 %v503_v47, %v274_v48  ;;  %vm271_vm6 = vmor %vm269_vm4, %vm270_vm5 }
  0x4e   : > { %v265_v52 = vmul.f32 %v505_v49, %v264_v50 }
  0x4f   : > { %v276_v53 = vmul.f32 0.5, %v275_v51 }
  0x50   : > { %v266_v54 = vmul.f32 0.5, %v265_v52 }
  0x51   : > { %v277_v55 = vsub.f32 1.5, %v276_v53 }
  0x52   : > { %v267_v56 = vsub.f32 1.5, %v266_v54 }
  0x53   : > { %v278_v57 = vmul.f32 %v503_v47, %v277_v55 }
  0x54   : > { %v268_v59 = vmul.f32 %v505_v49, %v267_v56 }
  0x55   : > { %v282_v60 = vsel %vm281_vm3, %v503_v47, %v278_v57 }
  0x56   : > { %v292_v0 = vrot.slane %v282_v60, 4  ;;  %v272_v1 = vsel %vm271_vm6, %v505_v49, %v268_v59 }
  0x58   : > { %v293_v6 = vsel %vm217_vm0, %v272_v1, %v292_v0 }
  0x59   : > { %v295_v7 = vmul.f32 %v293_v6, %v289_v5 }
  0x94   : > { %v299_v2 = vpop.permute.xlu0 %298 }
  0x95   : > { %v303_v8 = vperm.slane %v299_v2, %v302_v4 }
  0x97   : > { %v305_v10 = vmul.f32 %v303_v8, %v295_v7 }
  0x9c   : > { %v309_v9 = vpop.permute.xlu0 %308 }
  0x9d   : > { %v313_v11 = vperm.slane %v309_v9, %v302_v4 }
  0x9f   : > { %v315_v12 = vadd.f32 %v313_v11, %v305_v10 }
  0xa1   : > { %316 = vst [vmem:[%s206_s6] sm:$0xff] %v315_v12 }
  0xa2   : > { %563 = shalt.err (!%p560_p13)
}
  0xa3   : > { %439 = dma.vmem_to_hbm [thread:$0]  (%p693_p9), %s334_s7, 128, %s336_s8, %s318_s9  }
  0xa4 PF: > { %s347_s11 = sand.u32 1, %s598_s12   ;;  %p446_p0 = pnand %p423_p12, %p700_p11 }
  0xa5   : > { %s348_s28 = scalar_lea.sflag [#allocation4], %s347_s11 }
  0xa6   : > { %p447_p1 = pneg %p446_p0 }
  0xa8   : > { %593 = dma.done.wait (%p447_p1), %s348_s28, 128  }
  0xa9   : > { %595 = vsyncadd (%p447_p1), %s348_s28, 4294967168  ;;  %s19_s17 = sadd.s32 1, %s618_s17   ;;  %s792_s12 = smov %s602_s13 }
  0xaa   : > { %p16_p2 = scmp.ge.s32.totalorder %s19_s17, 4   ;;  %s793_s13 = smov %s606_s14 }
  0xab   : > { %s794_s14 = smov %s698_s26  ;;  %s795_s15 = smov %s614_s16 }
  0xac   : > { %s796_s16 = smov %s798_s20  ;;  %18 = sbr.rel (!%p16_p2) target bundleno = 6 (0x6), region = 77 }
  0xb1   :  { %354 = vsyncpa [#allocation3], 1 }
  0xb2   :  { %356 = vsyncpa [#allocation3 + $0x1], 1 }
  0xb3   :  { %357 = vsyncpa [#allocation4], 1 }
  0xb4   :  { %359 = vsyncpa [#allocation4 + $0x1], 1 }

</bundles_post_ra>
